<compile_context>
chip_gen: v7x
topology: tpu7x:2x2x1
jax: 0.10.0
libtpu: 0.0.40
codegen_flags: <defaults>
</compile_context>

<pallas_src>
import functools

import jax
import jax.numpy as jnp
from jax import lax
from jax.experimental import pallas as pl
from jax.experimental.pallas import tpu as pltpu


def _upsample_kernel(x_ref, w0_ref, w1_ref, b_ref, o_ref, *, h_blk, W, Cout):
    # x_ref : (Cin, h_blk*W)          NCHW block, spatial flattened on lanes
    # wk_ref: (Cin, 2*Cout)           columns ordered (kj, co), co fastest
    # b_ref : (1, 2*Cout)
    # o_ref : (h_blk, 2, W, 2*Cout)   dims (i, ki, j, kj*Cout + co)
    x = x_ref[...]
    b = b_ref[...].astype(jnp.float32)
    for ki, w_ref in enumerate((w0_ref, w1_ref)):       # unrolled, 2 iterations
        acc = lax.dot_general(
            x, w_ref[...],
            dimension_numbers=(((0,), (0,)), ((), ())),  # contract Cin; MXU takes transposed LHS
            preferred_element_type=jnp.float32,
        )                                                # (h_blk*W, 2*Cout)
        acc = acc + b
        o_ref[:, ki, :, :] = acc.reshape(h_blk, W, 2 * Cout).astype(o_ref.dtype)


def _pick_h_block(H, W, Cin, Cout, itemsize,
                  target_rows=2048, vmem_budget_bytes=12 * 1024 * 1024):
    """Number of image rows processed per grid step.

    Constraints:
      * h_blk divides H (no remainder blocks).
      * x-block's last dim (h_blk*W) is 128-lane aligned unless it spans the
        full H*W extent (BlockSpec (8,128) rule).
      * double-buffered VMEM footprint <= budget (fits v5e's 16 MiB scoped
        default and leaves headroom on v7x's 64 MiB physical VMEM).
      * row-tile of up to ~2048 rows to amortize per-grid-step overhead.
    """
    candidates = [d for d in range(1, H + 1)
                  if H % d == 0 and (d == H or (d * W) % 128 == 0)]

    def footprint(d):
        rows = d * W
        in_b = rows * Cin * itemsize
        out_b = d * 2 * W * 2 * Cout * itemsize
        acc_b = rows * 2 * Cout * 4                      # f32 accumulator
        return 2 * (in_b + out_b) + acc_b                # 2x = double buffering

    good = [d for d in candidates
            if footprint(d) <= vmem_budget_bytes and d * W <= max(target_rows, W)]
    return max(good) if good else min(candidates)


def upsample_conv_transpose2d(x_nchw, weight, bias):
    """ConvTranspose2d(kernel=2, stride=2) forward.

    x_nchw : (N, Cin, H, W)
    weight : (Cin, Cout, 2, 2)   (PyTorch ConvTranspose2d layout)
    bias   : (Cout,)
    returns: (N, Cout, 2H, 2W)
    """
    N, Cin, H, W = x_nchw.shape
    Cout = weight.shape[1]
    itemsize = jnp.dtype(x_nchw.dtype).itemsize

    h_blk = _pick_h_block(H, W, Cin, Cout, itemsize)
    rows = h_blk * W
    grid = (N, H // h_blk)

    # Free reshape: kernel reads NCHW directly (no input transpose HBM pass).
    x2 = x_nchw.reshape(N, Cin, H * W)

    # Weight (Cin, Cout, 2, 2) -> per-ki (Cin, 2*Cout) with columns (kj, co), co fastest.
    w_t = jnp.transpose(weight, (0, 2, 3, 1))            # (Cin, ki, kj, Cout) -- tiny
    w0 = w_t[:, 0].reshape(Cin, 2 * Cout)
    w1 = w_t[:, 1].reshape(Cin, 2 * Cout)
    b2 = jnp.tile(bias, 2).reshape(1, 2 * Cout)          # bias[kj*Cout + co] = bias[co]

    kernel = functools.partial(_upsample_kernel, h_blk=h_blk, W=W, Cout=Cout)

    flops = 2 * N * H * W * Cin * 4 * Cout
    bytes_accessed = itemsize * (N * Cin * H * W          # read x
                                 + N * 4 * H * W * Cout   # write y
                                 + 4 * Cin * Cout + Cout)  # weights + bias

    y5 = pl.pallas_call(
        kernel,
        out_shape=jax.ShapeDtypeStruct((N, H, 2, W, 2 * Cout), x_nchw.dtype),
        grid_spec=pltpu.PrefetchScalarGridSpec(
            num_scalar_prefetch=0,
            grid=grid,
            in_specs=[
                pl.BlockSpec((None, Cin, rows), lambda n, h: (n, 0, h)),
                # Grid-invariant operands (constant index_map).
                # TODO(synk): pipeline_mode=pl.Buffered(1) would drop their double
                # buffer; only matters for large Cin/Cout, skipped for portability.
                pl.BlockSpec((Cin, 2 * Cout), lambda n, h: (0, 0)),
                pl.BlockSpec((Cin, 2 * Cout), lambda n, h: (0, 0)),
                pl.BlockSpec((1, 2 * Cout), lambda n, h: (0, 0)),
            ],
            out_specs=pl.BlockSpec((None, h_blk, 2, W, 2 * Cout),
                                   lambda n, h: (n, h, 0, 0, 0)),
        ),
        compiler_params=pltpu.CompilerParams(
            dimension_semantics=("parallel", "parallel"),
            vmem_limit_bytes=32 * 1024 * 1024,
        ),
        cost_estimate=pl.CostEstimate(
            flops=flops, transcendentals=0, bytes_accessed=bytes_accessed),
    )(x2, w0, w1, b2)

    # (N, H, 2, W, 2*Cout) reshapes for free (bitcast) to NHWC (N, 2H, 2W, Cout).
    y_nhwc = y5.reshape(N, 2 * H, 2 * W, Cout)
    # TODO(synk): the remaining NHWC->NCHW transpose is the one leftover HBM pass
    # over the output; fusing it in-kernel would need stride-2 lane-interleaved
    # stores, which are not cleanly expressible / lane-dense on TPU today.
    return jnp.transpose(y_nhwc, (0, 3, 1, 2))


def _reference(x_nchw, weight, bias):
    """Pure-JAX reference of ConvTranspose2d(k=2, s=2) for validation."""
    N, Cin, H, W = x_nchw.shape
    Cout = weight.shape[1]
    y = jnp.einsum("ncij,cokl->noikjl", x_nchw, weight)   # (N, Cout, H, 2, W, 2)
    return y.reshape(N, Cout, 2 * H, 2 * W) + bias[None, :, None, None]


if __name__ == "__main__":
    key = jax.random.PRNGKey(0)
    k_x, k_w, k_b = jax.random.split(key, 3)

    N, Cin, Cout, H, W = 2, 4, 8, 16, 16
    x = jax.random.normal(k_x, (N, Cin, H, W), dtype=jnp.float32)
    # PyTorch ConvTranspose2d weight shape: (in_channels, out_channels, kH, kW)
    weight = jax.random.normal(k_w, (Cin, Cout, 2, 2), dtype=jnp.float32) * 0.1
    bias = jax.random.normal(k_b, (Cout,), dtype=jnp.float32) * 0.1

    up = jax.jit(upsample_conv_transpose2d)
    out = jax.block_until_ready(up(x, weight, bias))

    ref = _reference(x, weight, bias)
    assert out.shape == (N, Cout, 2 * H, 2 * W), out.shape
    assert jnp.allclose(out, ref, atol=1e-5, rtol=1e-5), "mismatch vs reference"

    print("KERNEL_OK")
</pallas_src>

<mosaic_0001>
module attributes {stable_mosaic.version = 11 : i64} {
  func.func @_upsample_kernel(%arg0: i32, %arg1: i32, %arg2: memref<1x4x256xf32, #tpu.memory_space<vmem>>, %arg3: memref<4x16xf32, #tpu.memory_space<vmem>>, %arg4: memref<4x16xf32, #tpu.memory_space<vmem>>, %arg5: memref<1x16xf32, #tpu.memory_space<vmem>>, %arg6: memref<1x16x2x16x16xf32, #tpu.memory_space<vmem>>) attributes {dimension_semantics = [#tpu.dimension_semantics<parallel>, #tpu.dimension_semantics<parallel>], iteration_bounds = array<i64: 2, 1>, scalar_prefetch = 0 : i64, scratch_operands = 0 : i64, tpu.core_type = #tpu.core_type<tc>, window_params = [{transform_indices = @transform_0, window_bounds = array<i64: 1, 4, 256>}, {pipeline_mode = #tpu.pipeline_mode<synchronous>, transform_indices = @transform_1, window_bounds = array<i64: 4, 16>}, {pipeline_mode = #tpu.pipeline_mode<synchronous>, transform_indices = @transform_2, window_bounds = array<i64: 4, 16>}, {pipeline_mode = #tpu.pipeline_mode<synchronous>, transform_indices = @transform_3, window_bounds = array<i64: 1, 16>}, {transform_indices = @transform_4, window_bounds = array<i64: 1, 16, 2, 16, 16>}]} {
    %c0 = arith.constant 0 : index
    %c0_0 = arith.constant 0 : index
    %c0_1 = arith.constant 0 : index
    %0 = vector.load %arg2[%c0, %c0_0, %c0_1] : memref<1x4x256xf32, #tpu.memory_space<vmem>>, vector<1x4x256xf32>
    %1 = vector.shape_cast %0 : vector<1x4x256xf32> to vector<4x256xf32>
    %c0_2 = arith.constant 0 : index
    %c0_3 = arith.constant 0 : index
    %2 = vector.load %arg5[%c0_2, %c0_3] : memref<1x16xf32, #tpu.memory_space<vmem>>, vector<1x16xf32>
    %c0_4 = arith.constant 0 : index
    %c0_5 = arith.constant 0 : index
    %3 = vector.load %arg3[%c0_4, %c0_5] : memref<4x16xf32, #tpu.memory_space<vmem>>, vector<4x16xf32>
    %cst = arith.constant dense<0.000000e+00> : vector<256x16xf32>
    %4 = tpu.matmul %1, %3, %cst {dimension_numbers = #tpu.dot_dimension_numbers<[0], [0], [1], [1], [0, 1, 1, 1], [], []>} : vector<4x256xf32>, vector<4x16xf32>, vector<256x16xf32> -> vector<256x16xf32>
    %5 = vector.broadcast %2 : vector<1x16xf32> to vector<256x16xf32>
    %6 = arith.addf %4, %5 : vector<256x16xf32>
    %7 = vector.shape_cast %6 : vector<256x16xf32> to vector<16x16x16xf32>
    %c0_6 = arith.constant 0 : index
    %c0_7 = arith.constant 0 : index
    %c0_8 = arith.constant 0 : index
    %c0_9 = arith.constant 0 : index
    %c0_10 = arith.constant 0 : index
    %8 = vector.load %arg6[%c0_6, %c0_7, %c0_8, %c0_9, %c0_10] : memref<1x16x2x16x16xf32, #tpu.memory_space<vmem>>, vector<1x16x1x16x16xf32>
    %9 = vector.shape_cast %8 : vector<1x16x1x16x16xf32> to vector<16x16x16xf32>
    %10 = vector.shape_cast %7 : vector<16x16x16xf32> to vector<1x16x1x16x16xf32>
    tpu.vector_store %arg6[%c0_6, %c0_7, %c0_8, %c0_9, %c0_10], %10 {strides = array<i32>} : memref<1x16x2x16x16xf32, #tpu.memory_space<vmem>>, vector<1x16x1x16x16xf32>,
    %c0_11 = arith.constant 0 : index
    %c0_12 = arith.constant 0 : index
    %11 = vector.load %arg4[%c0_11, %c0_12] : memref<4x16xf32, #tpu.memory_space<vmem>>, vector<4x16xf32>
    %cst_13 = arith.constant dense<0.000000e+00> : vector<256x16xf32>
    %12 = tpu.matmul %1, %11, %cst_13 {dimension_numbers = #tpu.dot_dimension_numbers<[0], [0], [1], [1], [0, 1, 1, 1], [], []>} : vector<4x256xf32>, vector<4x16xf32>, vector<256x16xf32> -> vector<256x16xf32>
    %13 = vector.broadcast %2 : vector<1x16xf32> to vector<256x16xf32>
    %14 = arith.addf %12, %13 : vector<256x16xf32>
    %15 = vector.shape_cast %14 : vector<256x16xf32> to vector<16x16x16xf32>
    %c0_14 = arith.constant 0 : index
    %c0_15 = arith.constant 0 : index
    %c1 = arith.constant 1 : index
    %c0_16 = arith.constant 0 : index
    %c0_17 = arith.constant 0 : index
    %16 = vector.load %arg6[%c0_14, %c0_15, %c1, %c0_16, %c0_17] : memref<1x16x2x16x16xf32, #tpu.memory_space<vmem>>, vector<1x16x1x16x16xf32>
    %17 = vector.shape_cast %16 : vector<1x16x1x16x16xf32> to vector<16x16x16xf32>
    %18 = vector.shape_cast %15 : vector<16x16x16xf32> to vector<1x16x1x16x16xf32>
    tpu.vector_store %arg6[%c0_14, %c0_15, %c1, %c0_16, %c0_17], %18 {strides = array<i32>} : memref<1x16x2x16x16xf32, #tpu.memory_space<vmem>>, vector<1x16x1x16x16xf32>,
    return
  }
  func.func @transform_0(%arg0: i32, %arg1: i32) -> (i32, i32, i32) {
    %c0_i32 = arith.constant 0 : i32
    %c0_i32_0 = arith.constant 0 : i32
    return %arg0, %c0_i32, %arg1 : i32, i32, i32
  }
  func.func @transform_1(%arg0: i32, %arg1: i32) -> (i32, i32) {
    %c0_i32 = arith.constant 0 : i32
    %c0_i32_0 = arith.constant 0 : i32
    %c0_i32_1 = arith.constant 0 : i32
    return %c0_i32, %c0_i32_0 : i32, i32
  }
  func.func @transform_2(%arg0: i32, %arg1: i32) -> (i32, i32) {
    %c0_i32 = arith.constant 0 : i32
    %c0_i32_0 = arith.constant 0 : i32
    %c0_i32_1 = arith.constant 0 : i32
    return %c0_i32, %c0_i32_0 : i32, i32
  }
  func.func @transform_3(%arg0: i32, %arg1: i32) -> (i32, i32) {
    %c0_i32 = arith.constant 0 : i32
    %c0_i32_0 = arith.constant 0 : i32
    %c0_i32_1 = arith.constant 0 : i32
    return %c0_i32, %c0_i32_0 : i32, i32
  }
  func.func @transform_4(%arg0: i32, %arg1: i32) -> (i32, i32, i32, i32, i32) {
    %c0_i32 = arith.constant 0 : i32
    %c0_i32_0 = arith.constant 0 : i32
    %c0_i32_1 = arith.constant 0 : i32
    %c0_i32_2 = arith.constant 0 : i32
    return %arg0, %arg1, %c0_i32, %c0_i32_0, %c0_i32_1 : i32, i32, i32, i32, i32
  }
}

</mosaic_0001>

<bundles_post_ra>
// kernel: tile.8
= control target key start
LH: loop header
LB: loop body
LE: loop exit
PB: predicated region body
PF: predicated region fallthrough
CT: control target
= control target key end

     0   :  { %s22_s0 = inlined_call_operand.vmem [shape: f32[8], index: 0, kind: input, shape index: {}]   ;;  %s23_s1 = inlined_call_operand.vmem [shape: f32[2,8], index: 1, kind: output, shape index: {}]  }
   0x1   :  { %v4_v0 = vld [vmem:[%s22_s0] ss:$0 sm:$0xff] }
   0x2   :  { %5 = vst [vmem:[%s23_s1] sm:$0x3] %v4_v0 }

// kernel: tile.9
= control target key start
LH: loop header
LB: loop body
LE: loop exit
PB: predicated region body
PF: predicated region fallthrough
CT: control target
= control target key end

     0   :  { %vm7_vm0 = vcmask 64512   ;;  %vm13_vm1 = vcmask 130112   ;;  %s39_s0 = inlined_call_operand.vmem [shape: f32[2,8], index: 0, kind: input, shape index: {}]   ;;  %s40_s1 = inlined_call_operand.vmem [shape: f32[1,16], index: 1, kind: output, shape index: {}]  }
   0x1   :  { %v4_v0 = vld [vmem:[%s39_s0] sm:$0x3]  ;;  %s22_s0 = smov 8  }
   0x2   :  { %5 = vst [vmem:[#allocation1] sm:$0x3] %v4_v0 }
   0x9   :  { %v10_v1 = vld [vmem:[#allocation1 + $0x1] sm:$0x1]   ;;  %v6_v2 = vld [vmem:[#allocation1] sm:$0x1]  }
   0xa   :  { %11 = vrot.lane.b32.xlu0 %v10_v1, %s22_s0  ;;  %8 = vst.msk [vmem:[#allocation0] sm:$0x1] %vm7_vm0, %v6_v2  }
  0x7c   :  { %v12_v3 = vpop.permute.xlu0 %11  }
  0x7d   :  { %14 = vst.msk [vmem:[#allocation0] sm:$0x1] %vm13_vm1, %v12_v3  }
  0x84   :  { %v18_v4 = vld [vmem:[#allocation0] sm:$0x1] }
  0x85   :  { %20 = vst [vmem:[%s40_s1] sm:$0x1] %v18_v4 }

// kernel: squeeze.3
= control target key start
LH: loop header
LB: loop body
LE: loop exit
PB: predicated region body
PF: predicated region fallthrough
CT: control target
= control target key end

     0   :  { %vm21_vm0 = vcmask 64512   ;;  %vm27_vm1 = vcmask 130112   ;;  %s67_s0 = inlined_call_operand.vmem [shape: f32[4,1,2,8], index: 0, kind: input, shape index: {}]   ;;  %s68_s1 = inlined_call_operand.vmem [shape: f32[4,16], index: 1, kind: output, shape index: {}]  }
   0x1   :  { %v37_v0 = vld [vmem:[%s67_s0 + $0x6] sm:$0x3]  ;;  %v38_v1 = vld [vmem:[%s67_s0 + $0x4] sm:$0x3]  ;;  %v39_v2 = vld [vmem:[%s67_s0 + $0x2] sm:$0x3] }
   0x2   :  { %8 = vst [vmem:[#allocation1 + $0x18] sm:$0x3] %v37_v0  ;;  %13 = vst [vmem:[#allocation1 + $0x10] sm:$0x3] %v38_v1  ;;  %v18_v3 = vld [vmem:[%s67_s0] sm:$0x3] }
   0x3   :  { %17 = vst [vmem:[#allocation1 + $0x8] sm:$0x3] %v39_v2  ;;  %19 = vst [vmem:[#allocation1] sm:$0x3] %v18_v3  ;;  %s41_s0 = smov 8  }
   0xa   :  { %v24_v4 = vld [vmem:[#allocation1 + $0x1] ss:$8 sm:$0xf]   ;;  %v20_v5 = vld [vmem:[#allocation1] ss:$8 sm:$0xf]  }
   0xb   :  { %25 = vrot.lane.b32.xlu0 %v24_v4, %s41_s0  ;;  %22 = vst.msk [vmem:[#allocation0] sm:$0xf] %vm21_vm0, %v20_v5  }
  0x7d   :  { %v26_v6 = vpop.permute.xlu0 %25  }
  0x7e   :  { %28 = vst.msk [vmem:[#allocation0] sm:$0xf] %vm27_vm1, %v26_v6  }
  0x85   :  { %v32_v7 = vld [vmem:[#allocation0] sm:$0xf] }
  0x86   :  { %34 = vst [vmem:[%s68_s1] sm:$0xf] %v32_v7 }

// kernel: upsample_conv_transpose2d.1
= control target key start
LH: loop header
LB: loop body
LE: loop exit
PB: predicated region body
PF: predicated region fallthrough
CT: control target
= control target key end

     0   :  { %s1382_s15 = smov 0   ;;  %s1384_s16 = smov 0   ;;  %s1688_s0 = inlined_call_operand.vmem [shape: f32[2,4,256], index: 0, kind: input, shape index: {}]   ;;  %s1689_s1 = inlined_call_operand.vmem [shape: f32[4,16], index: 1, kind: input, shape index: {}]   ;;  %s1690_s2 = inlined_call_operand.vmem [shape: f32[4,16], index: 2, kind: input, shape index: {}]   ;;  %s1691_s3 = inlined_call_operand.vmem [shape: f32[1,16], index: 3, kind: input, shape index: {}]   ;;  %s1692_s4 = inlined_call_operand.vmem [shape: f32[2,16,2,16,16], index: 4, kind: output, shape index: {}]  }
   0x1   :  { %s1386_s17 = smov 0  }
   0x2 LB: > { %s26_s18 = sadd.s32 1, %s1351_s16  ;;  %p1033_p0 = scmp.ge.s32.totalorder %s1355_s17, 1  ;;  %s1355_s17 = sphi %s1386_s17, %s14_s17   ;;  %s1351_s16 = sphi %s1384_s16, %s1694_s16   ;;  %s1347_s15 = sphi %s1382_s15, %s1693_s15  }
   0x3   : > { %p28_p1 = scmp.ge.s32.totalorder %s26_s18, 2  ;;  %p183_p2 = scmp.lt.s32.totalorder %s1355_s17, 3 }
   0x5   : > { %s1696_s18 = smov (%p28_p1, %s26_s18), 0  ;;  %p184_p3 = pnand %p1033_p0, %p183_p2 }
   0x6   : > { %p219_p4 = scmp.lt.s32.totalorder (!%p184_p3), %s1347_s15, 1  ;;  %v241_v1 = vld [vmem:[%s1689_s1] sm:$0xf] (!%p184_p3)  ;;  %vm412_vm0 = vcmask (!%p184_p3), 1043456   ;;  %vm315_vm1 = vcmask (!%p184_p3), 31744   ;;  %vm641_vm2 = vcmask (!%p184_p3), 130048  }
   0x7   : > { %187 = sbr.rel (%p184_p3) target bundleno = 487 (0x1e7), region = 36  ;;  %v674_v2 = vld [vmem:[%s1690_s2] sm:$0xf] (!%p184_p3)  ;;  %1207 = vmatprep.subr.msk.mxu0 (!%p184_p3), %vm412_vm0, %v241_v1 }
   0x8   : > { %1257 = vmatprep.subr.msk.mxu1 (!%p184_p3), %vm412_vm0, %v674_v2  ;;  %1208 = vmatpush3.msk.msra.mxu0 (!%p184_p3), %vm412_vm0, %v241_v1  ;;  %v1480_v36 = vld [vmem:[%s1691_s3] ss:$0 sm:$0xff] (!%p184_p3) }
   0x9   : > { %1258 = vmatpush3.msk.msra.mxu1 (!%p184_p3), %vm412_vm0, %v674_v2 }
   0xe   : > { %s1698_s15 = smov (!%p219_p4, %s1347_s15), 1 }
   0xf   : > { %s1139_s19 = sshll.u32 %s1698_s15, 3  ;;  %s1140_s27 = sshll.u32 %s1698_s15, 9 }
  0x10   : > { %s226_s22 = scalar_lea.vmem %s1688_s0, %s1139_s19  ;;  %s1485_s6 = scalar_lea.vmem %s1692_s4, %s1140_s27 }
  0x11   : > { %v239_v0 = vld [vmem:[%s226_s22] sm:$0xff] }
  0x12   : > { %251 = vxpose.xlu0.b32.start.end [1/1] (short) %v239_v0, 128  ;;  %v249_v3 = vcombine.high %v239_v0, %v239_v0 }
  0x4f   : > { %283 = vxpose.xlu0.b32.start.end [1/1] (short) %v249_v3, 128 }
  0x92   : > { %v267_v4 = vpop.trf.xlu0 }
  0x93   : > { %1209 = vmatprep.mubr.msk.f32.mxu0 %vm315_vm1, %v267_v4  ;;  %1259 = vmatprep.mubr.msk.f32.mxu1 %vm315_vm1, %v267_v4 }
  0x96   : > { %v268_v5 = vpop.trf.xlu0 }
  0x97   : > { %1210 = vmatmul.mubr.msk.f32.vlgmr.msra.gmra.mrb[0].mxu0 %vm315_vm1, %v268_v5  ;;  %1260 = vmatmul.mubr.msk.f32.vlgmr.msra.gmra.mrb[0].mxu1 %vm315_vm1, %v268_v5 }
  0x9a   : > { %v269_v6 = vpop.trf.xlu0 }
  0x9b   : > { %1212 = vmatprep.mubr.msk.f32.mxu0 %vm315_vm1, %v269_v6  ;;  %1262 = vmatprep.mubr.msk.f32.mxu1 %vm315_vm1, %v269_v6 }
  0x9e   : > { %v270_v7 = vpop.trf.xlu0 }
  0x9f   : > { %1213 = vmatmul.mubr.msk.f32.gmra.mrb[2].mxu0 %vm315_vm1, %v270_v7  ;;  %1263 = vmatmul.mubr.msk.f32.gmra.mrb[2].mxu1 %vm315_vm1, %v270_v7 }
  0xa2   : > { %v271_v8 = vpop.trf.xlu0 }
  0xa3   : > { %1215 = vmatprep.mubr.msk.f32.mxu0 %vm315_vm1, %v271_v8  ;;  %1265 = vmatprep.mubr.msk.f32.mxu1 %vm315_vm1, %v271_v8 }
  0xa6   : > { %v272_v9 = vpop.trf.xlu0 }
  0xa7   : > { %1216 = vmatmul.mubr.msk.f32.gmra.mrb[4].mxu0 %vm315_vm1, %v272_v9  ;;  %1266 = vmatmul.mubr.msk.f32.gmra.mrb[4].mxu1 %vm315_vm1, %v272_v9 }
  0xaa   : > { %v273_v10 = vpop.trf.xlu0 }
  0xab   : > { %1218 = vmatprep.mubr.msk.f32.mxu0 %vm315_vm1, %v273_v10  ;;  %1268 = vmatprep.mubr.msk.f32.mxu1 %vm315_vm1, %v273_v10 }
  0xae   : > { %v274_v11 = vpop.trf.xlu0 }
  0xaf   : > { %1219 = vmatmul.mubr.msk.f32.gmra.mrb[6].mxu0 %vm315_vm1, %v274_v11  ;;  %1269 = vmatmul.mubr.msk.f32.gmra.mrb[6].mxu1 %vm315_vm1, %v274_v11 }
  0xb2   : > { %v275_v12 = vpop.trf.xlu0 }
  0xb3   : > { %1221 = vmatprep.mubr.msk.f32.mxu0 %vm315_vm1, %v275_v12  ;;  %1271 = vmatprep.mubr.msk.f32.mxu1 %vm315_vm1, %v275_v12 }
  0xb6   : > { %v276_v13 = vpop.trf.xlu0 }
  0xb7   : > { %1222 = vmatmul.mubr.msk.f32.gmra.mrb[8].mxu0 %vm315_vm1, %v276_v13  ;;  %1272 = vmatmul.mubr.msk.f32.gmra.mrb[8].mxu1 %vm315_vm1, %v276_v13 }
  0xba   : > { %v277_v14 = vpop.trf.xlu0 }
  0xbb   : > { %1224 = vmatprep.mubr.msk.f32.mxu0 %vm315_vm1, %v277_v14  ;;  %1274 = vmatprep.mubr.msk.f32.mxu1 %vm315_vm1, %v277_v14 }
  0xbe   : > { %v278_v15 = vpop.trf.xlu0 }
  0xbf   : > { %1225 = vmatmul.mubr.msk.f32.gmra.mrb[10].mxu0 %vm315_vm1, %v278_v15  ;;  %1275 = vmatmul.mubr.msk.f32.gmra.mrb[10].mxu1 %vm315_vm1, %v278_v15 }
  0xc2   : > { %v279_v16 = vpop.trf.xlu0 }
  0xc3   : > { %1227 = vmatprep.mubr.msk.f32.mxu0 %vm315_vm1, %v279_v16  ;;  %1277 = vmatprep.mubr.msk.f32.mxu1 %vm315_vm1, %v279_v16 }
  0xc6   : > { %v280_v17 = vpop.trf.xlu0 }
  0xc7   : > { %1228 = vmatmul.mubr.msk.f32.gmra.mrb[12].mxu0 %vm315_vm1, %v280_v17  ;;  %1278 = vmatmul.mubr.msk.f32.gmra.mrb[12].mxu1 %vm315_vm1, %v280_v17 }
  0xca   : > { %v281_v18 = vpop.trf.xlu0 }
  0xcb   : > { %1230 = vmatprep.mubr.msk.f32.mxu0 %vm315_vm1, %v281_v18  ;;  %1280 = vmatprep.mubr.msk.f32.mxu1 %vm315_vm1, %v281_v18 }
  0xce   : > { %v282_v19 = vpop.trf.xlu0 }
  0xcf   : > { %1231 = vmatmul.mubr.msk.f32.gmra.mrb[14].mxu0 %vm315_vm1, %v282_v19  ;;  %1281 = vmatmul.mubr.msk.f32.gmra.mrb[14].mxu1 %vm315_vm1, %v282_v19 }
  0xd2   : > { %v299_v20 = vpop.trf.xlu0 }
  0xd3   : > { %1233 = vmatprep.mubr.msk.f32.mxu0 %vm315_vm1, %v299_v20  ;;  %1283 = vmatprep.mubr.msk.f32.mxu1 %vm315_vm1, %v299_v20 }
  0xd6   : > { %v300_v21 = vpop.trf.xlu0 }
  0xd7   : > { %1234 = vmatmul.mubr.msk.f32.gmra.mrb[16].mxu0 %vm315_vm1, %v300_v21  ;;  %1284 = vmatmul.mubr.msk.f32.gmra.mrb[16].mxu1 %vm315_vm1, %v300_v21 }
  0xda   : > { %v301_v22 = vpop.trf.xlu0 }
  0xdb   : > { %1236 = vmatprep.mubr.msk.f32.mxu0 %vm315_vm1, %v301_v22  ;;  %1286 = vmatprep.mubr.msk.f32.mxu1 %vm315_vm1, %v301_v22 }
  0xde   : > { %v302_v23 = vpop.trf.xlu0 }
  0xdf   : > { %1237 = vmatmul.mubr.msk.f32.gmra.mrb[18].mxu0 %vm315_vm1, %v302_v23  ;;  %1287 = vmatmul.mubr.msk.f32.gmra.mrb[18].mxu1 %vm315_vm1, %v302_v23 }
  0xe2   : > { %v303_v24 = vpop.trf.xlu0 }
  0xe3   : > { %1239 = vmatprep.mubr.msk.f32.mxu0 %vm315_vm1, %v303_v24  ;;  %1289 = vmatprep.mubr.msk.f32.mxu1 %vm315_vm1, %v303_v24 }
  0xe6   : > { %v304_v25 = vpop.trf.xlu0 }
  0xe7   : > { %1240 = vmatmul.mubr.msk.f32.gmra.mrb[20].mxu0 %vm315_vm1, %v304_v25  ;;  %1290 = vmatmul.mubr.msk.f32.gmra.mrb[20].mxu1 %vm315_vm1, %v304_v25 }
  0xea   : > { %v305_v26 = vpop.trf.xlu0 }
  0xeb   : > { %1242 = vmatprep.mubr.msk.f32.mxu0 %vm315_vm1, %v305_v26  ;;  %1292 = vmatprep.mubr.msk.f32.mxu1 %vm315_vm1, %v305_v26 }
  0xee   : > { %v306_v27 = vpop.trf.xlu0 }
  0xef   : > { %1243 = vmatmul.mubr.msk.f32.gmra.mrb[22].mxu0 %vm315_vm1, %v306_v27  ;;  %1293 = vmatmul.mubr.msk.f32.gmra.mrb[22].mxu1 %vm315_vm1, %v306_v27 }
  0xf2   : > { %v307_v28 = vpop.trf.xlu0 }
  0xf3   : > { %1245 = vmatprep.mubr.msk.f32.mxu0 %vm315_vm1, %v307_v28  ;;  %1295 = vmatprep.mubr.msk.f32.mxu1 %vm315_vm1, %v307_v28 }
  0xf6   : > { %v308_v29 = vpop.trf.xlu0 }
  0xf7   : > { %1246 = vmatmul.mubr.msk.f32.gmra.mrb[24].mxu0 %vm315_vm1, %v308_v29  ;;  %1296 = vmatmul.mubr.msk.f32.gmra.mrb[24].mxu1 %vm315_vm1, %v308_v29 }
  0xfa   : > { %v309_v30 = vpop.trf.xlu0 }
  0xfb   : > { %1248 = vmatprep.mubr.msk.f32.mxu0 %vm315_vm1, %v309_v30  ;;  %1298 = vmatprep.mubr.msk.f32.mxu1 %vm315_vm1, %v309_v30 }
  0xfe   : > { %v310_v31 = vpop.trf.xlu0 }
  0xff   : > { %1249 = vmatmul.mubr.msk.f32.gmra.mrb[26].mxu0 %vm315_vm1, %v310_v31  ;;  %1299 = vmatmul.mubr.msk.f32.gmra.mrb[26].mxu1 %vm315_vm1, %v310_v31 }
 0x102   : > { %v311_v32 = vpop.trf.xlu0 }
 0x103   : > { %1251 = vmatprep.mubr.msk.f32.mxu0 %vm315_vm1, %v311_v32  ;;  %1301 = vmatprep.mubr.msk.f32.mxu1 %vm315_vm1, %v311_v32 }
 0x106   : > { %v312_v33 = vpop.trf.xlu0 }
 0x107   : > { %1252 = vmatmul.mubr.msk.f32.gmra.mrb[28].mxu0 %vm315_vm1, %v312_v33  ;;  %1302 = vmatmul.mubr.msk.f32.gmra.mrb[28].mxu1 %vm315_vm1, %v312_v33 }
 0x10a   : > { %v313_v34 = vpop.trf.xlu0 }
 0x10b   : > { %1254 = vmatprep.mubr.msk.f32.mxu0 %vm315_vm1, %v313_v34  ;;  %1304 = vmatprep.mubr.msk.f32.mxu1 %vm315_vm1, %v313_v34 }
 0x10e   : > { %v314_v35 = vpop.trf.xlu0 }
 0x10f   : > { %1255 = vmatmul.mubr.msk.f32.gmra.mrb[30].mxu0 %vm315_vm1, %v314_v35  ;;  %1305 = vmatmul.mubr.msk.f32.gmra.mrb[30].mxu1 %vm315_vm1, %v314_v35 }
 0x16a   : > { %v1211_v37 = vpop.f32.mrb[0].mxu0  ;;  %v1261_v38 = vpop.f32.mrb[0].mxu1 }
 0x16b   : > { %v488_v39 = vadd.f32 %v1211_v37, %v1480_v36  ;;  %v750_v40 = vadd.f32 %v1261_v38, %v1480_v36  ;;  %v482_v41 = vpop.f32.mrb[1].mxu0  ;;  %v744_v42 = vpop.f32.mrb[1].mxu1 }
 0x16c   : > { %v483_v43 = vadd.f32 %v1480_v36, %v482_v41  ;;  %v745_v44 = vadd.f32 %v1480_v36, %v744_v42 }
 0x16d   : > { %643 = vst.msk [vmem:[%s1485_s6 + $0x8] sm:$0xff] %vm641_vm2, %v488_v39  ;;  %1106 = vst.msk [vmem:[%s1485_s6 + $0x18] sm:$0xff] %vm641_vm2, %v750_v40 }
 0x16e   : > { %642 = vst.msk [vmem:[%s1485_s6] sm:$0xff] %vm641_vm2, %v483_v43  ;;  %1105 = vst.msk [vmem:[%s1485_s6 + $0x10] sm:$0xff] %vm641_vm2, %v745_v44 }
 0x172   : > { %v1214_v45 = vpop.f32.mrb[2].mxu0  ;;  %v1264_v46 = vpop.f32.mrb[2].mxu1 }
 0x173   : > { %v498_v47 = vadd.f32 %v1214_v45, %v1480_v36  ;;  %v760_v48 = vadd.f32 %v1264_v46, %v1480_v36  ;;  %v492_v49 = vpop.f32.mrb[3].mxu0  ;;  %v754_v50 = vpop.f32.mrb[3].mxu1 }
 0x174   : > { %v493_v51 = vadd.f32 %v1480_v36, %v492_v49  ;;  %v755_v52 = vadd.f32 %v1480_v36, %v754_v50 }
 0x175   : > { %645 = vst.msk [vmem:[%s1485_s6 + $0x28] sm:$0xff] %vm641_vm2, %v498_v47  ;;  %1108 = vst.msk [vmem:[%s1485_s6 + $0x38] sm:$0xff] %vm641_vm2, %v760_v48 }
 0x176   : > { %644 = vst.msk [vmem:[%s1485_s6 + $0x20] sm:$0xff] %vm641_vm2, %v493_v51  ;;  %1107 = vst.msk [vmem:[%s1485_s6 + $0x30] sm:$0xff] %vm641_vm2, %v755_v52 }
 0x17a   : > { %v1217_v53 = vpop.f32.mrb[4].mxu0  ;;  %v1267_v54 = vpop.f32.mrb[4].mxu1 }
 0x17b   : > { %v508_v55 = vadd.f32 %v1217_v53, %v1480_v36  ;;  %v770_v56 = vadd.f32 %v1267_v54, %v1480_v36  ;;  %v502_v57 = vpop.f32.mrb[5].mxu0  ;;  %v764_v58 = vpop.f32.mrb[5].mxu1 }
 0x17c   : > { %v503_v59 = vadd.f32 %v1480_v36, %v502_v57  ;;  %v765_v60 = vadd.f32 %v1480_v36, %v764_v58 }
 0x17d   : > { %647 = vst.msk [vmem:[%s1485_s6 + $0x48] sm:$0xff] %vm641_vm2, %v508_v55  ;;  %1110 = vst.msk [vmem:[%s1485_s6 + $0x58] sm:$0xff] %vm641_vm2, %v770_v56 }
 0x17e   : > { %646 = vst.msk [vmem:[%s1485_s6 + $0x40] sm:$0xff] %vm641_vm2, %v503_v59  ;;  %1109 = vst.msk [vmem:[%s1485_s6 + $0x50] sm:$0xff] %vm641_vm2, %v765_v60 }
 0x182   : > { %v1220_v61 = vpop.f32.mrb[6].mxu0  ;;  %v1270_v62 = vpop.f32.mrb[6].mxu1 }
 0x183   : > { %v518_v63 = vadd.f32 %v1220_v61, %v1480_v36  ;;  %v780_v0 = vadd.f32 %v1270_v62, %v1480_v36  ;;  %v512_v1 = vpop.f32.mrb[7].mxu0  ;;  %v774_v2 = vpop.f32.mrb[7].mxu1 }
 0x184   : > { %v513_v3 = vadd.f32 %v1480_v36, %v512_v1  ;;  %v775_v4 = vadd.f32 %v1480_v36, %v774_v2 }
 0x185   : > { %649 = vst.msk [vmem:[%s1485_s6 + $0x68] sm:$0xff] %vm641_vm2, %v518_v63  ;;  %1112 = vst.msk [vmem:[%s1485_s6 + $0x78] sm:$0xff] %vm641_vm2, %v780_v0 }
 0x186   : > { %648 = vst.msk [vmem:[%s1485_s6 + $0x60] sm:$0xff] %vm641_vm2, %v513_v3  ;;  %1111 = vst.msk [vmem:[%s1485_s6 + $0x70] sm:$0xff] %vm641_vm2, %v775_v4 }
 0x18a   : > { %v1223_v5 = vpop.f32.mrb[8].mxu0  ;;  %v1273_v6 = vpop.f32.mrb[8].mxu1 }
 0x18b   : > { %v528_v7 = vadd.f32 %v1223_v5, %v1480_v36  ;;  %v790_v8 = vadd.f32 %v1273_v6, %v1480_v36  ;;  %v522_v9 = vpop.f32.mrb[9].mxu0  ;;  %v784_v10 = vpop.f32.mrb[9].mxu1 }
 0x18c   : > { %v523_v11 = vadd.f32 %v1480_v36, %v522_v9  ;;  %v785_v12 = vadd.f32 %v1480_v36, %v784_v10 }
 0x18d   : > { %651 = vst.msk [vmem:[%s1485_s6 + $0x88] sm:$0xff] %vm641_vm2, %v528_v7  ;;  %1114 = vst.msk [vmem:[%s1485_s6 + $0x98] sm:$0xff] %vm641_vm2, %v790_v8 }
 0x18e   : > { %650 = vst.msk [vmem:[%s1485_s6 + $0x80] sm:$0xff] %vm641_vm2, %v523_v11  ;;  %1113 = vst.msk [vmem:[%s1485_s6 + $0x90] sm:$0xff] %vm641_vm2, %v785_v12 }
 0x192   : > { %v1226_v13 = vpop.f32.mrb[10].mxu0  ;;  %v1276_v14 = vpop.f32.mrb[10].mxu1 }
 0x193   : > { %v538_v15 = vadd.f32 %v1226_v13, %v1480_v36  ;;  %v800_v16 = vadd.f32 %v1276_v14, %v1480_v36  ;;  %v532_v17 = vpop.f32.mrb[11].mxu0  ;;  %v794_v18 = vpop.f32.mrb[11].mxu1 }
 0x194   : > { %v533_v19 = vadd.f32 %v1480_v36, %v532_v17  ;;  %v795_v20 = vadd.f32 %v1480_v36, %v794_v18 }
 0x195   : > { %653 = vst.msk [vmem:[%s1485_s6 + $0xa8] sm:$0xff] %vm641_vm2, %v538_v15  ;;  %1116 = vst.msk [vmem:[%s1485_s6 + $0xb8] sm:$0xff] %vm641_vm2, %v800_v16 }
 0x196   : > { %652 = vst.msk [vmem:[%s1485_s6 + $0xa0] sm:$0xff] %vm641_vm2, %v533_v19  ;;  %1115 = vst.msk [vmem:[%s1485_s6 + $0xb0] sm:$0xff] %vm641_vm2, %v795_v20 }
 0x19a   : > { %v1229_v21 = vpop.f32.mrb[12].mxu0  ;;  %v1279_v22 = vpop.f32.mrb[12].mxu1 }
 0x19b   : > { %v548_v23 = vadd.f32 %v1229_v21, %v1480_v36  ;;  %v810_v24 = vadd.f32 %v1279_v22, %v1480_v36  ;;  %v542_v25 = vpop.f32.mrb[13].mxu0  ;;  %v804_v26 = vpop.f32.mrb[13].mxu1 }
 0x19c   : > { %v543_v27 = vadd.f32 %v1480_v36, %v542_v25  ;;  %v805_v28 = vadd.f32 %v1480_v36, %v804_v26 }
 0x19d   : > { %655 = vst.msk [vmem:[%s1485_s6 + $0xc8] sm:$0xff] %vm641_vm2, %v548_v23  ;;  %1118 = vst.msk [vmem:[%s1485_s6 + $0xd8] sm:$0xff] %vm641_vm2, %v810_v24 }
 0x19e   : > { %654 = vst.msk [vmem:[%s1485_s6 + $0xc0] sm:$0xff] %vm641_vm2, %v543_v27  ;;  %1117 = vst.msk [vmem:[%s1485_s6 + $0xd0] sm:$0xff] %vm641_vm2, %v805_v28 }
 0x1a2   : > { %v1232_v29 = vpop.f32.mrb[14].mxu0  ;;  %v1282_v30 = vpop.f32.mrb[14].mxu1 }
 0x1a3   : > { %v558_v31 = vadd.f32 %v1232_v29, %v1480_v36  ;;  %v820_v32 = vadd.f32 %v1282_v30, %v1480_v36  ;;  %v552_v33 = vpop.f32.mrb[15].mxu0  ;;  %v814_v34 = vpop.f32.mrb[15].mxu1 }
 0x1a4   : > { %v553_v35 = vadd.f32 %v1480_v36, %v552_v33  ;;  %v815_v37 = vadd.f32 %v1480_v36, %v814_v34 }
 0x1a5   : > { %657 = vst.msk [vmem:[%s1485_s6 + $0xe8] sm:$0xff] %vm641_vm2, %v558_v31  ;;  %1120 = vst.msk [vmem:[%s1485_s6 + $0xf8] sm:$0xff] %vm641_vm2, %v820_v32 }
 0x1a6   : > { %656 = vst.msk [vmem:[%s1485_s6 + $0xe0] sm:$0xff] %vm641_vm2, %v553_v35  ;;  %1119 = vst.msk [vmem:[%s1485_s6 + $0xf0] sm:$0xff] %vm641_vm2, %v815_v37 }
 0x1aa   : > { %v1235_v38 = vpop.f32.mrb[16].mxu0  ;;  %v1285_v39 = vpop.f32.mrb[16].mxu1 }
 0x1ab   : > { %v568_v40 = vadd.f32 %v1235_v38, %v1480_v36  ;;  %v830_v41 = vadd.f32 %v1285_v39, %v1480_v36  ;;  %v562_v42 = vpop.f32.mrb[17].mxu0  ;;  %v824_v43 = vpop.f32.mrb[17].mxu1 }
 0x1ac   : > { %v563_v44 = vadd.f32 %v1480_v36, %v562_v42  ;;  %v825_v45 = vadd.f32 %v1480_v36, %v824_v43 }
 0x1ad   : > { %659 = vst.msk [vmem:[%s1485_s6 + $0x108] sm:$0xff] %vm641_vm2, %v568_v40  ;;  %1122 = vst.msk [vmem:[%s1485_s6 + $0x118] sm:$0xff] %vm641_vm2, %v830_v41 }
 0x1ae   : > { %658 = vst.msk [vmem:[%s1485_s6 + $0x100] sm:$0xff] %vm641_vm2, %v563_v44  ;;  %1121 = vst.msk [vmem:[%s1485_s6 + $0x110] sm:$0xff] %vm641_vm2, %v825_v45 }
 0x1b2   : > { %v1238_v46 = vpop.f32.mrb[18].mxu0  ;;  %v1288_v47 = vpop.f32.mrb[18].mxu1 }
 0x1b3   : > { %v578_v48 = vadd.f32 %v1238_v46, %v1480_v36  ;;  %v840_v49 = vadd.f32 %v1288_v47, %v1480_v36  ;;  %v572_v50 = vpop.f32.mrb[19].mxu0  ;;  %v834_v51 = vpop.f32.mrb[19].mxu1 }
 0x1b4   : > { %v573_v52 = vadd.f32 %v1480_v36, %v572_v50  ;;  %v835_v53 = vadd.f32 %v1480_v36, %v834_v51 }
 0x1b5   : > { %661 = vst.msk [vmem:[%s1485_s6 + $0x128] sm:$0xff] %vm641_vm2, %v578_v48  ;;  %1124 = vst.msk [vmem:[%s1485_s6 + $0x138] sm:$0xff] %vm641_vm2, %v840_v49 }
 0x1b6   : > { %660 = vst.msk [vmem:[%s1485_s6 + $0x120] sm:$0xff] %vm641_vm2, %v573_v52  ;;  %1123 = vst.msk [vmem:[%s1485_s6 + $0x130] sm:$0xff] %vm641_vm2, %v835_v53 }
 0x1ba   : > { %v1241_v54 = vpop.f32.mrb[20].mxu0  ;;  %v1291_v55 = vpop.f32.mrb[20].mxu1 }
 0x1bb   : > { %v588_v56 = vadd.f32 %v1241_v54, %v1480_v36  ;;  %v850_v57 = vadd.f32 %v1291_v55, %v1480_v36  ;;  %v582_v58 = vpop.f32.mrb[21].mxu0  ;;  %v844_v59 = vpop.f32.mrb[21].mxu1 }
 0x1bc   : > { %v583_v60 = vadd.f32 %v1480_v36, %v582_v58  ;;  %v845_v61 = vadd.f32 %v1480_v36, %v844_v59 }
 0x1bd   : > { %663 = vst.msk [vmem:[%s1485_s6 + $0x148] sm:$0xff] %vm641_vm2, %v588_v56  ;;  %1126 = vst.msk [vmem:[%s1485_s6 + $0x158] sm:$0xff] %vm641_vm2, %v850_v57 }
 0x1be   : > { %662 = vst.msk [vmem:[%s1485_s6 + $0x140] sm:$0xff] %vm641_vm2, %v583_v60  ;;  %1125 = vst.msk [vmem:[%s1485_s6 + $0x150] sm:$0xff] %vm641_vm2, %v845_v61 }
 0x1c2   : > { %v1244_v62 = vpop.f32.mrb[22].mxu0  ;;  %v1294_v63 = vpop.f32.mrb[22].mxu1 }
 0x1c3   : > { %v598_v0 = vadd.f32 %v1244_v62, %v1480_v36  ;;  %v860_v1 = vadd.f32 %v1294_v63, %v1480_v36  ;;  %v592_v2 = vpop.f32.mrb[23].mxu0  ;;  %v854_v3 = vpop.f32.mrb[23].mxu1 }
 0x1c4   : > { %v593_v4 = vadd.f32 %v1480_v36, %v592_v2  ;;  %v855_v5 = vadd.f32 %v1480_v36, %v854_v3 }
 0x1c5   : > { %665 = vst.msk [vmem:[%s1485_s6 + $0x168] sm:$0xff] %vm641_vm2, %v598_v0  ;;  %1128 = vst.msk [vmem:[%s1485_s6 + $0x178] sm:$0xff] %vm641_vm2, %v860_v1 }
 0x1c6   : > { %664 = vst.msk [vmem:[%s1485_s6 + $0x160] sm:$0xff] %vm641_vm2, %v593_v4  ;;  %1127 = vst.msk [vmem:[%s1485_s6 + $0x170] sm:$0xff] %vm641_vm2, %v855_v5 }
 0x1ca   : > { %v1247_v6 = vpop.f32.mrb[24].mxu0  ;;  %v1297_v7 = vpop.f32.mrb[24].mxu1 }
 0x1cb   : > { %v608_v8 = vadd.f32 %v1247_v6, %v1480_v36  ;;  %v870_v9 = vadd.f32 %v1297_v7, %v1480_v36  ;;  %v602_v10 = vpop.f32.mrb[25].mxu0  ;;  %v864_v11 = vpop.f32.mrb[25].mxu1 }
 0x1cc   : > { %v603_v12 = vadd.f32 %v1480_v36, %v602_v10  ;;  %v865_v13 = vadd.f32 %v1480_v36, %v864_v11 }
 0x1cd   : > { %667 = vst.msk [vmem:[%s1485_s6 + $0x188] sm:$0xff] %vm641_vm2, %v608_v8  ;;  %1130 = vst.msk [vmem:[%s1485_s6 + $0x198] sm:$0xff] %vm641_vm2, %v870_v9 }
 0x1ce   : > { %666 = vst.msk [vmem:[%s1485_s6 + $0x180] sm:$0xff] %vm641_vm2, %v603_v12  ;;  %1129 = vst.msk [vmem:[%s1485_s6 + $0x190] sm:$0xff] %vm641_vm2, %v865_v13 }
 0x1d2   : > { %v1250_v14 = vpop.f32.mrb[26].mxu0  ;;  %v1300_v15 = vpop.f32.mrb[26].mxu1 }
 0x1d3   : > { %v618_v16 = vadd.f32 %v1250_v14, %v1480_v36  ;;  %v880_v17 = vadd.f32 %v1300_v15, %v1480_v36  ;;  %v612_v18 = vpop.f32.mrb[27].mxu0  ;;  %v874_v19 = vpop.f32.mrb[27].mxu1 }
 0x1d4   : > { %v613_v20 = vadd.f32 %v1480_v36, %v612_v18  ;;  %v875_v21 = vadd.f32 %v1480_v36, %v874_v19 }
 0x1d5   : > { %669 = vst.msk [vmem:[%s1485_s6 + $0x1a8] sm:$0xff] %vm641_vm2, %v618_v16  ;;  %1132 = vst.msk [vmem:[%s1485_s6 + $0x1b8] sm:$0xff] %vm641_vm2, %v880_v17 }
 0x1d6   : > { %668 = vst.msk [vmem:[%s1485_s6 + $0x1a0] sm:$0xff] %vm641_vm2, %v613_v20  ;;  %1131 = vst.msk [vmem:[%s1485_s6 + $0x1b0] sm:$0xff] %vm641_vm2, %v875_v21 }
 0x1da   : > { %v1253_v22 = vpop.f32.mrb[28].mxu0  ;;  %v1303_v23 = vpop.f32.mrb[28].mxu1 }
 0x1db   : > { %v628_v24 = vadd.f32 %v1253_v22, %v1480_v36  ;;  %v890_v25 = vadd.f32 %v1303_v23, %v1480_v36  ;;  %v622_v26 = vpop.f32.mrb[29].mxu0  ;;  %v884_v27 = vpop.f32.mrb[29].mxu1 }
 0x1dc   : > { %v623_v28 = vadd.f32 %v1480_v36, %v622_v26  ;;  %v885_v29 = vadd.f32 %v1480_v36, %v884_v27 }
 0x1dd   : > { %671 = vst.msk [vmem:[%s1485_s6 + $0x1c8] sm:$0xff] %vm641_vm2, %v628_v24  ;;  %1134 = vst.msk [vmem:[%s1485_s6 + $0x1d8] sm:$0xff] %vm641_vm2, %v890_v25 }
 0x1de   : > { %670 = vst.msk [vmem:[%s1485_s6 + $0x1c0] sm:$0xff] %vm641_vm2, %v623_v28  ;;  %1133 = vst.msk [vmem:[%s1485_s6 + $0x1d0] sm:$0xff] %vm641_vm2, %v885_v29 }
 0x1e2   : > { %v1256_v30 = vpop.f32.mrb[30].mxu0  ;;  %v1306_v31 = vpop.f32.mrb[30].mxu1 }
 0x1e3   : > { %v638_v32 = vadd.f32 %v1256_v30, %v1480_v36  ;;  %v900_v33 = vadd.f32 %v1306_v31, %v1480_v36  ;;  %v632_v34 = vpop.f32.mrb[31].mxu0  ;;  %v894_v35 = vpop.f32.mrb[31].mxu1 }
 0x1e4   : > { %v633_v37 = vadd.f32 %v1480_v36, %v632_v34  ;;  %v895_v38 = vadd.f32 %v1480_v36, %v894_v35 }
 0x1e5   : > { %673 = vst.msk [vmem:[%s1485_s6 + $0x1e8] sm:$0xff] %vm641_vm2, %v638_v32  ;;  %1136 = vst.msk [vmem:[%s1485_s6 + $0x1f8] sm:$0xff] %vm641_vm2, %v900_v33 }
 0x1e6   : > { %672 = vst.msk [vmem:[%s1485_s6 + $0x1e0] sm:$0xff] %vm641_vm2, %v633_v37  ;;  %1135 = vst.msk [vmem:[%s1485_s6 + $0x1f0] sm:$0xff] %vm641_vm2, %v895_v38 }
 0x1e7 PF: > { %s14_s17 = sadd.s32 1, %s1355_s17   ;;  %s1693_s15 = smov %s1351_s16 }
 0x1e8   : > { %p11_p5 = scmp.ge.s32.totalorder %s14_s17, 4   ;;  %s1694_s16 = smov %s1696_s18 }
 0x1ea   :  { %13 = sbr.rel (!%p11_p5) target bundleno = 2 (0x2), region = 67 }

</bundles_post_ra>
